<compile_context>
chip_gen: v6e
topology: v6e:2x2x1
jax: 0.10.0
libtpu: 0.0.40
codegen_flags: <defaults>
</compile_context>

<pallas_src>
import functools

import jax
import jax.numpy as jnp
from jax.experimental import pallas as pl
from jax.experimental.pallas import tpu as pltpu


def channel_attention_kernel(x_ref, w1t_ref, w2t_ref, o_ref, sum_ref, max_ref,
                             *, hw_total, hw_chunk):
    # x_ref:   (bn, C, hw_chunk)  batch block x spatial chunk (lane-dense)
    # w1t_ref: (C, Ch)            fc1 weight, pre-transposed (Ch = C // ratio)
    # w2t_ref: (Ch, C)            fc2 weight, pre-transposed
    # o_ref:   (bn, C)            sigmoid channel gate (written at last chunk)
    # sum_ref/max_ref: (bn, C)    f32 running pooling accumulators (VMEM scratch)
    k = pl.program_id(1)

    @pl.when(k == 0)
    def _():
        sum_ref[...] = jnp.zeros_like(sum_ref)
        max_ref[...] = jnp.full_like(max_ref, -jnp.inf)

    x = x_ref[...]                                   # native dtype, no f32 copy
    if hw_total % hw_chunk != 0:
        # Ragged trailing H*W chunk: mask out-of-range lanes (sum: 0, max: -inf).
        lane = jax.lax.broadcasted_iota(jnp.int32, x.shape, dimension=2)
        valid = (k * hw_chunk + lane) < hw_total
        x_sum = jnp.where(valid, x, jnp.zeros((), dtype=x.dtype))
        x_max = jnp.where(valid, x, jnp.array(-jnp.inf, dtype=x.dtype))
    else:
        x_sum = x
        x_max = x

    sum_ref[...] += jnp.sum(x_sum, axis=-1, dtype=jnp.float32)          # (bn, C)
    max_ref[...] = jnp.maximum(max_ref[...],
                               jnp.max(x_max, axis=-1).astype(jnp.float32))

    @pl.when(k == pl.num_programs(1) - 1)
    def _():
        bn = sum_ref.shape[0]
        avg = sum_ref[...] * (1.0 / float(hw_total))                    # (bn, C)
        mx = max_ref[...]                                               # (bn, C)
        # Shared MLP is row-wise: stack avg/max rows, run fc1/relu/fc2 once.
        pooled = jnp.concatenate([avg, mx], axis=0)                     # (2bn, C)
        w1t = w1t_ref[...].astype(jnp.float32)
        w2t = w2t_ref[...].astype(jnp.float32)
        h = jnp.maximum(
            jnp.dot(pooled, w1t, preferred_element_type=jnp.float32), 0.0)
        y = jnp.dot(h, w2t, preferred_element_type=jnp.float32)         # (2bn, C)
        gate = jax.nn.sigmoid(y[:bn] + y[bn:])       # avg_out + max_out -> sigmoid
        o_ref[...] = gate.astype(o_ref.dtype)


def _vmem_capacity_bytes():
    try:
        cap = getattr(pltpu.get_tpu_info(), "vmem_capacity_bytes", None)
        if cap:
            return int(cap)
    except Exception:
        pass
    return 64 * 1024 * 1024   # conservative fallback (v7x per-TC size)


def channel_attention(x, w1, w2, *, input_block_budget_bytes=None):
    """x: (N, C, H, W); w1: (C//r, C) fc1 weight; w2: (C, C//r) fc2 weight.
    Returns the sigmoid gate with shape (N, C, 1, 1), matching the PyTorch module."""
    N, C, H, W = x.shape
    Ch = w1.shape[0]
    HW = H * W
    itemsize = jnp.dtype(x.dtype).itemsize

    # --- generation-aware VMEM budgets -------------------------------------
    vmem_cap = _vmem_capacity_bytes()
    if vmem_cap > 64 * 1024 * 1024:
        # v5e / v6e: 128 MiB VMEM, single TensorCore.
        dual_core = False
        default_budget = 88 * 1024 * 1024       # two ~44 MiB input buffers
        vmem_limit_cap = 104 * 1024 * 1024
    else:
        # v7x-like: 64 MiB VMEM per TensorCore, 2 TensorCores per chip.
        dual_core = True
        default_budget = 30 * 1024 * 1024       # two ~15 MiB input buffers
        vmem_limit_cap = 52 * 1024 * 1024
    if input_block_budget_bytes is None:
        input_block_budget_bytes = default_budget
    per_buffer_budget = max(1, input_block_budget_bytes // 2)   # double-buffered

    # --- H*W chunking (only when one image exceeds the per-buffer budget) ---
    row_bytes = C * HW * itemsize
    if row_bytes <= per_buffer_budget:
        hw_chunk = HW
    else:
        lanes_budget = per_buffer_budget // (C * itemsize)
        hw_chunk = max(128, (lanes_budget // 128) * 128)    # multiple of 128 lanes
        hw_chunk = min(hw_chunk, HW)
    n_hw = pl.cdiv(HW, hw_chunk)

    # --- batch block size bn -------------------------------------------------
    block_img_bytes = C * hw_chunk * itemsize
    max_bn = max(1, per_buffer_budget // block_img_bytes)
    if dual_core and N >= 2:
        # Keep >= 2 batch steps per TensorCore (pipelining + megacore sharding)
        # unless that would shrink blocks below ~2 MiB.
        min_steps = 4 if N >= 4 else 2
        cap = max(1, N // min_steps)
        floor_bn = max(1, (2 * 1024 * 1024) // block_img_bytes)
        max_bn = min(max_bn, max(cap, floor_bn))
    bn = max(1, min(N, max_bn))
    if bn < N and bn >= 8:
        bn = (bn // 8) * 8                       # sublane-aligned output blocks
    n_batch = pl.cdiv(N, bn)                     # ragged final block (masked store)

    # Wrapper-side glue (free for contiguous NCHW): lane-dense view + transposed weights.
    x2 = x.reshape(N, C, HW)
    w1t = jnp.transpose(w1)                      # (C, Ch)
    w2t = jnp.transpose(w2)                      # (Ch, C)

    # Scoped-VMEM limit: double-buffered blocks + weights + scratch + slack,
    # at least 32 MiB (above v5e's 16 MiB scoped default), capped per generation.
    w_itemsize = jnp.dtype(w1.dtype).itemsize
    vmem_need = (2 * bn * block_img_bytes                 # double-buffered input (dominant)
                 + 2 * 2 * C * Ch * w_itemsize            # both weights, double-buffered
                 + 2 * bn * C * itemsize                  # double-buffered output blocks
                 + 2 * bn * C * 4                         # f32 sum/max scratch
                 + (2 << 20))                             # Mosaic internal scratch slack
    vmem_limit = int(min(max(vmem_need, 32 * 1024 * 1024), vmem_limit_cap))

    kernel = functools.partial(channel_attention_kernel,
                               hw_total=HW, hw_chunk=hw_chunk)
    out = pl.pallas_call(
        kernel,
        out_shape=jax.ShapeDtypeStruct((N, C), x.dtype),
        grid_spec=pltpu.PrefetchScalarGridSpec(
            num_scalar_prefetch=0,
            grid=(n_batch, n_hw),
            in_specs=[
                pl.BlockSpec((bn, C, hw_chunk), lambda i, k: (i, 0, k)),
                # Constant index_map: weights stay resident, not re-fetched.
                pl.BlockSpec((C, Ch), lambda i, k: (0, 0)),
                pl.BlockSpec((Ch, C), lambda i, k: (0, 0)),
            ],
            out_specs=pl.BlockSpec((bn, C), lambda i, k: (i, 0)),
            scratch_shapes=[
                pltpu.VMEM((bn, C), jnp.float32),   # running sum
                pltpu.VMEM((bn, C), jnp.float32),   # running max
            ],
        ),
        compiler_params=pltpu.CompilerParams(
            dimension_semantics=("parallel", "arbitrary"),
            vmem_limit_bytes=vmem_limit,
        ),
    )(x2, w1t, w2t)
    return out.reshape(N, C, 1, 1)


def channel_attention_ref(x, w1, w2):
    # Pure-JAX reference mirroring the PyTorch forward.
    avg = jnp.mean(x, axis=(2, 3))                # (N, C)
    mx = jnp.max(x, axis=(2, 3))                  # (N, C)

    def mlp(v):
        h = jnp.maximum(v @ w1.T, 0.0)
        return h @ w2.T

    out = jax.nn.sigmoid(mlp(avg) + mlp(mx))      # (N, C)
    return out[:, :, None, None]


if __name__ == "__main__":
    # Small shapes consistent with the module: in_channels=32, ratio=16 -> hidden=2.
    N, C, H, W = 2, 32, 16, 16
    ratio = 16
    Ch = C // ratio

    key = jax.random.PRNGKey(0)
    kx, k1, k2, kx2 = jax.random.split(key, 4)
    x = jax.random.normal(kx, (N, C, H, W), dtype=jnp.float32)
    # Deterministic synthetic weights (1x1 conv, no bias): fc1 (Ch, C), fc2 (C, Ch).
    w1 = 0.1 * jax.random.normal(k1, (Ch, C), dtype=jnp.float32)
    w2 = 0.1 * jax.random.normal(k2, (C, Ch), dtype=jnp.float32)

    out = jax.block_until_ready(channel_attention(x, w1, w2))
    ref = channel_attention_ref(x, w1, w2)
    assert out.shape == (N, C, 1, 1)
    assert jnp.allclose(out, ref, atol=1e-5, rtol=1e-5), "mismatch vs reference"

    # Also exercise the H*W-chunked path (ragged tail + multi-step accumulation)
    # by forcing a tiny input-block budget.
    x2 = jax.random.normal(kx2, (3, C, 24, 24), dtype=jnp.float32)
    out2 = jax.block_until_ready(
        channel_attention(x2, w1, w2, input_block_budget_bytes=64 * 1024))
    ref2 = channel_attention_ref(x2, w1, w2)
    assert jnp.allclose(out2, ref2, atol=1e-5, rtol=1e-5), "chunked-path mismatch"

    print("KERNEL_OK")
</pallas_src>

<mosaic_0001>
module attributes {stable_mosaic.version = 11 : i64} {
  func.func @channel_attention_kernel(%arg0: i32, %arg1: i32, %arg2: memref<2x32x256xf32, #tpu.memory_space<vmem>>, %arg3: memref<32x2xf32, #tpu.memory_space<vmem>>, %arg4: memref<2x32xf32, #tpu.memory_space<vmem>>, %arg5: memref<2x32xf32, #tpu.memory_space<vmem>>, %arg6: memref<2x32xf32, #tpu.memory_space<vmem>>, %arg7: memref<2x32xf32, #tpu.memory_space<vmem>>) attributes {dimension_semantics = [#tpu.dimension_semantics<parallel>, #tpu.dimension_semantics<arbitrary>], iteration_bounds = array<i64: 1, 1>, scalar_prefetch = 0 : i64, scratch_operands = 2 : i64, tpu.core_type = #tpu.core_type<tc>, window_params = [{transform_indices = @transform_0, window_bounds = array<i64: 2, 32, 256>}, {pipeline_mode = #tpu.pipeline_mode<synchronous>, transform_indices = @transform_1, window_bounds = array<i64: 32, 2>}, {pipeline_mode = #tpu.pipeline_mode<synchronous>, transform_indices = @transform_2, window_bounds = array<i64: 2, 32>}, {transform_indices = @transform_3, window_bounds = array<i64: 2, 32>}]} {
    %c0_i32 = arith.constant 0 : i32
    %0 = arith.cmpi eq, %arg1, %c0_i32 : i32
    %1 = arith.extui %0 : i1 to i32
    %c0_i32_0 = arith.constant 0 : i32
    %2 = arith.cmpi ne, %1, %c0_i32_0 : i32
    scf.if %2 {
      %cst_14 = arith.constant 0.000000e+00 : f32
      %15 = vector.broadcast %cst_14 : f32 to vector<2x32xf32>
      %c0_15 = arith.constant 0 : index
      %c0_16 = arith.constant 0 : index
      %16 = vector.load %arg6[%c0_15, %c0_16] : memref<2x32xf32, #tpu.memory_space<vmem>>, vector<2x32xf32>
      tpu.vector_store %arg6[%c0_15, %c0_16], %15 {strides = array<i32>} : memref<2x32xf32, #tpu.memory_space<vmem>>, vector<2x32xf32>,
      %cst_17 = arith.constant 0xFF800000 : f32
      %17 = vector.broadcast %cst_17 : f32 to vector<2x32xf32>
      %c0_18 = arith.constant 0 : index
      %c0_19 = arith.constant 0 : index
      %18 = vector.load %arg7[%c0_18, %c0_19] : memref<2x32xf32, #tpu.memory_space<vmem>>, vector<2x32xf32>
      tpu.vector_store %arg7[%c0_18, %c0_19], %17 {strides = array<i32>} : memref<2x32xf32, #tpu.memory_space<vmem>>, vector<2x32xf32>,
    } else {
    }
    %c0 = arith.constant 0 : index
    %c0_1 = arith.constant 0 : index
    %c0_2 = arith.constant 0 : index
    %3 = vector.load %arg2[%c0, %c0_1, %c0_2] : memref<2x32x256xf32, #tpu.memory_space<vmem>>, vector<2x32x256xf32>
    %c0_3 = arith.constant 0 : index
    %c0_4 = arith.constant 0 : index
    %4 = vector.load %arg6[%c0_3, %c0_4] : memref<2x32xf32, #tpu.memory_space<vmem>>, vector<2x32xf32>
    %cst = arith.constant dense<0.000000e+00> : vector<2x32xf32>
    %5 = vector.multi_reduction <add>, %3, %cst [2] : vector<2x32x256xf32> to vector<2x32xf32>
    %6 = arith.addf %4, %5 : vector<2x32xf32>
    %c0_5 = arith.constant 0 : index
    %c0_6 = arith.constant 0 : index
    %7 = vector.load %arg6[%c0_5, %c0_6] : memref<2x32xf32, #tpu.memory_space<vmem>>, vector<2x32xf32>
    tpu.vector_store %arg6[%c0_5, %c0_6], %6 {strides = array<i32>} : memref<2x32xf32, #tpu.memory_space<vmem>>, vector<2x32xf32>,
    %c0_7 = arith.constant 0 : index
    %c0_8 = arith.constant 0 : index
    %8 = vector.load %arg7[%c0_7, %c0_8] : memref<2x32xf32, #tpu.memory_space<vmem>>, vector<2x32xf32>
    %cst_9 = arith.constant dense<0xFF800000> : vector<2x32xf32>
    %9 = vector.multi_reduction <maximumf>, %3, %cst_9 [2] : vector<2x32x256xf32> to vector<2x32xf32>
    %10 = arith.maximumf %8, %9 : vector<2x32xf32>
    %c0_10 = arith.constant 0 : index
    %c0_11 = arith.constant 0 : index
    %11 = vector.load %arg7[%c0_10, %c0_11] : memref<2x32xf32, #tpu.memory_space<vmem>>, vector<2x32xf32>
    tpu.vector_store %arg7[%c0_10, %c0_11], %10 {strides = array<i32>} : memref<2x32xf32, #tpu.memory_space<vmem>>, vector<2x32xf32>,
    %c0_i32_12 = arith.constant 0 : i32
    %12 = arith.cmpi eq, %arg1, %c0_i32_12 : i32
    %13 = arith.extui %12 : i1 to i32
    %c0_i32_13 = arith.constant 0 : i32
    %14 = arith.cmpi ne, %13, %c0_i32_13 : i32
    scf.if %14 {
      %c0_14 = arith.constant 0 : index
      %c0_15 = arith.constant 0 : index
      %15 = vector.load %arg6[%c0_14, %c0_15] : memref<2x32xf32, #tpu.memory_space<vmem>>, vector<2x32xf32>
      %cst_16 = arith.constant 3.906250e-03 : f32
      %16 = vector.broadcast %cst_16 : f32 to vector<2x32xf32>
      %17 = arith.mulf %15, %16 : vector<2x32xf32>
      %c0_17 = arith.constant 0 : index
      %c0_18 = arith.constant 0 : index
      %18 = vector.load %arg7[%c0_17, %c0_18] : memref<2x32xf32, #tpu.memory_space<vmem>>, vector<2x32xf32>
      %19 = tpu.concatenate %17, %18 in 0 : vector<2x32xf32>, vector<2x32xf32> -> vector<4x32xf32>
      %c0_19 = arith.constant 0 : index
      %c0_20 = arith.constant 0 : index
      %20 = vector.load %arg3[%c0_19, %c0_20] : memref<32x2xf32, #tpu.memory_space<vmem>>, vector<32x2xf32>
      %c0_21 = arith.constant 0 : index
      %c0_22 = arith.constant 0 : index
      %21 = vector.load %arg4[%c0_21, %c0_22] : memref<2x32xf32, #tpu.memory_space<vmem>>, vector<2x32xf32>
      %cst_23 = arith.constant dense<0.000000e+00> : vector<4x2xf32>
      %22 = tpu.matmul %19, %20, %cst_23 {dimension_numbers = #tpu.dot_dimension_numbers<[1], [0], [0], [1], [0, 0, 1, 1], [], []>} : vector<4x32xf32>, vector<32x2xf32>, vector<4x2xf32> -> vector<4x2xf32>
      %cst_24 = arith.constant 0.000000e+00 : f32
      %23 = vector.broadcast %cst_24 : f32 to vector<4x2xf32>
      %24 = arith.maximumf %22, %23 : vector<4x2xf32>
      %cst_25 = arith.constant dense<0.000000e+00> : vector<4x32xf32>
      %25 = tpu.matmul %24, %21, %cst_25 {dimension_numbers = #tpu.dot_dimension_numbers<[1], [0], [0], [1], [0, 0, 1, 1], [], []>} : vector<4x2xf32>, vector<2x32xf32>, vector<4x32xf32> -> vector<4x32xf32>
      %26 = vector.extract_strided_slice %25 {offsets = [0, 0], sizes = [2, 32], strides = [1, 1]} : vector<4x32xf32> to vector<2x32xf32>
      %27 = vector.extract_strided_slice %25 {offsets = [2, 0], sizes = [2, 32], strides = [1, 1]} : vector<4x32xf32> to vector<2x32xf32>
      %28 = arith.addf %26, %27 : vector<2x32xf32>
      %29 = arith.negf %28 : vector<2x32xf32>
      %30 = math.exp %29 : vector<2x32xf32>
      %cst_26 = arith.constant 1.000000e+00 : f32
      %31 = vector.broadcast %cst_26 : f32 to vector<2x32xf32>
      %32 = arith.addf %31, %30 : vector<2x32xf32>
      %33 = arith.divf %31, %32 : vector<2x32xf32>
      %c0_27 = arith.constant 0 : index
      %c0_28 = arith.constant 0 : index
      %34 = vector.load %arg5[%c0_27, %c0_28] : memref<2x32xf32, #tpu.memory_space<vmem>>, vector<2x32xf32>
      tpu.vector_store %arg5[%c0_27, %c0_28], %33 {strides = array<i32>} : memref<2x32xf32, #tpu.memory_space<vmem>>, vector<2x32xf32>,
    } else {
    }
    return
  }
  func.func @transform_0(%arg0: i32, %arg1: i32) -> (i32, i32, i32) {
    %c0_i32 = arith.constant 0 : i32
    %c0_i32_0 = arith.constant 0 : i32
    return %arg0, %c0_i32, %arg1 : i32, i32, i32
  }
  func.func @transform_1(%arg0: i32, %arg1: i32) -> (i32, i32) {
    %c0_i32 = arith.constant 0 : i32
    %c0_i32_0 = arith.constant 0 : i32
    %c0_i32_1 = arith.constant 0 : i32
    return %c0_i32, %c0_i32_0 : i32, i32
  }
  func.func @transform_2(%arg0: i32, %arg1: i32) -> (i32, i32) {
    %c0_i32 = arith.constant 0 : i32
    %c0_i32_0 = arith.constant 0 : i32
    %c0_i32_1 = arith.constant 0 : i32
    return %c0_i32, %c0_i32_0 : i32, i32
  }
  func.func @transform_3(%arg0: i32, %arg1: i32) -> (i32, i32) {
    %c0_i32 = arith.constant 0 : i32
    %c0_i32_0 = arith.constant 0 : i32
    return %arg0, %c0_i32 : i32, i32
  }
}

</mosaic_0001>

<bundles_post_ra>
// kernel: tpu_custom_call.1
= control target key start
LH: loop header
LB: loop body
LE: loop exit
PB: predicated region body
PF: predicated region fallthrough
CT: control target
= control target key end

     0   :  { %8 = vsyncpa [#allocation5], 0  ;;  %s555_s0 = inlined_call_operand.hbm [shape: f32[2,32,256], index: 0, kind: input, shape index: {}]   ;;  %s556_s1 = inlined_call_operand.vmem [shape: f32[32,2], index: 1, kind: input, shape index: {}]   ;;  %s557_s2 = inlined_call_operand.vmem [shape: f32[2,32], index: 2, kind: input, shape index: {}]   ;;  %s558_s3 = inlined_call_operand.hbm [shape: f32[2,32], index: 3, kind: output, shape index: {}]  }
   0x1   :  { %9 = vsyncpa [#allocation6], 0  ;;  %s488_s12 = smov [#allocation4]  }
   0x2   :  { %s15_s13 = sshll.u32 %s488_s12, 4  ;;  %s16_s13 = int_to_ptr.vmem [resolvable:$true] %s15_s13 }
   0x3   :  { %s452_s14 = scalar_lea.vmem %s16_s13, 2048  ;;  %p457_p1 = scmp.lt.s32.totalorder %s16_s13, %s16_s13 }
   0x4   :  { %p453_p0 = scmp.ne.s32.totalorder %s16_s13, %s452_s14  ;;  %p458_p2 = scmp.lt.s32.totalorder %s452_s14, %s452_s14 }
   0x6   :  { %p459_p3 = por %p458_p2, %p457_p1 }
   0x8   :  { %p460_p4 = pnand %p459_p3, %p453_p0 }
   0xa   :  { %463 = shalt.err (!%p460_p4)
}
   0xb   :  { %s489_s15 = smov 256   ;;  %s490_s16 = smov 16  }
   0xc   :  { %21 = dma.hbm_to_vmem [thread:$0]  %s555_s0, 2048, %s16_s13, [#allocation5], %s489_s15, %s489_s15, %s490_s16  }
   0xd   :  { %484 = dma.done.wait [#allocation5], 2048  }
   0xe   :  { %485 = vsyncadd [#allocation5], 4294965248  ;;  %v44_v0 = vld [vmem:[#allocation4 + $0x40] sm:$0xff]  ;;  %v45_v1 = vld [vmem:[#allocation4 + $0x48] sm:$0xff]  ;;  %vm33_vm0 = vcmask 254976   ;;  %v491_v32 = vmov 0.0   ;;  %v85_v42 = vlaneseq }
   0xf   :  { %v36_v2 = vld [vmem:[#allocation4] sm:$0xff]  ;;  %v65_v3 = vadd.f32 %v45_v1, %v44_v0  ;;  %v37_v4 = vld [vmem:[#allocation4 + $0x8] sm:$0xff]  ;;  %v46_v5 = vld [vmem:[#allocation4 + $0x50] sm:$0xff]  ;;  %v150_v15 = vmax.f32 %v44_v0, %v45_v1  ;;  %34 = vst.msk [vmem:[#allocation2] sm:$0x3] %vm33_vm0, %v491_v32  ;;  %417 = vmatprep.subr.mxu0 %v491_v32  ;;  %428 = vmatprep.subr.mxu1 %v491_v32  ;;  %v492_v33 = vmov -inf  }
  0x10   :  { %v47_v6 = vld [vmem:[#allocation4 + $0x58] sm:$0xff]  ;;  %v53_v7 = vadd.f32 %v37_v4, %v36_v2  ;;  %v38_v8 = vld [vmem:[#allocation4 + $0x10] sm:$0xff]  ;;  %v138_v13 = vmax.f32 %v36_v2, %v37_v4  ;;  %v48_v16 = vld [vmem:[#allocation4 + $0x60] sm:$0xff]  ;;  %35 = vst.msk [vmem:[#allocation3] sm:$0x3] %vm33_vm0, %v492_v33  ;;  %vm493_vm1 = vmmov 0  }
  0x11   :  { %v39_v9 = vld [vmem:[#allocation4 + $0x18] sm:$0xff]  ;;  %66 = vadd.xlane.f32.xlu1 %v65_v3  ;;  %v68_v10 = vadd.f32 %v47_v6, %v46_v5  ;;  %v153_v14 = vmax.f32 %v46_v5, %v47_v6  ;;  %v49_v17 = vld [vmem:[#allocation4 + $0x68] sm:$0xff]  ;;  %v40_v18 = vld [vmem:[#allocation4 + $0x20] sm:$0xff]  ;;  %425 = vmatprep.mubr.msk.f32.mxu0 %vm493_vm1, %v491_v32  ;;  %v86_v45 = vand.u32 127, %v85_v42  ;;  %v88_v49 = vshrl.u32 %v85_v42, 7  ;;  %s494_s27 = smov [#allocation7]  }
  0x12   :  { %54 = vadd.xlane.f32.xlu0 %v53_v7  ;;  %v56_v11 = vadd.f32 %v39_v9, %v38_v8  ;;  %v141_v12 = vmax.f32 %v38_v8, %v39_v9  ;;  %v41_v19 = vld [vmem:[#allocation4 + $0x28] sm:$0xff]  ;;  %v71_v20 = vadd.f32 %v49_v17, %v48_v16  ;;  %v156_v22 = vmax.f32 %v48_v16, %v49_v17  ;;  %v50_v24 = vld [vmem:[#allocation4 + $0x70] sm:$0xff]  ;;  %v51_v25 = vld [vmem:[#allocation4 + $0x78] sm:$0xff]  ;;  %s397_s28 = sshll.u32 %s494_s27, 4  ;;  %s398_s28 = int_to_ptr.vmem [resolvable:$true] %s397_s28 }
  0x13   :  { %v59_v21 = vadd.f32 %v41_v19, %v40_v18  ;;  %v144_v23 = vmax.f32 %v40_v18, %v41_v19  ;;  %v42_v26 = vld [vmem:[#allocation4 + $0x30] sm:$0xff]  ;;  %v43_v27 = vld [vmem:[#allocation4 + $0x38] sm:$0xff]  ;;  %v74_v28 = vadd.f32 %v51_v25, %v50_v24  ;;  %v159_v30 = vmax.f32 %v50_v24, %v51_v25  ;;  %v224_v36 = vld [vmem:[%s556_s1 + $0x8] sm:$0xff]  ;;  %430 = vmatprep.mubr.msk.f32.mxu1 %vm493_vm1, %v491_v32  ;;  %p469_p6 = scmp.lt.s32.totalorder %s398_s28, %s398_s28 }
  0x14   :  { %v62_v29 = vadd.f32 %v43_v27, %v42_v26  ;;  %v147_v31 = vmax.f32 %v42_v26, %v43_v27  ;;  %v226_v34 = vld [vmem:[%s556_s1 + $0x18] sm:$0xff]  ;;  %v225_v35 = vld [vmem:[%s556_s1 + $0x10] sm:$0xff]  ;;  %v223_v37 = vld [vmem:[%s556_s1] sm:$0xff]  ;;  %v91_v46 = vadd.s32 4294967288, %v86_v45  ;;  %v98_v50 = vadd.s32 4294967280, %v86_v45 }
  0x15   :  { %69 = vadd.xlane.f32.xlu1 %v68_v10  ;;  %418 = vmatpush3.msra.mxu0 %v226_v34  ;;  %v105_v54 = vadd.s32 4294967272, %v86_v45  ;;  %v89_v55 = vsub.s32 %v86_v45, %v88_v49  ;;  %vm96_vm2 = vcmask 130112   ;;  %vm103_vm3 = vcmask 195712  }
  0x16   :  { %57 = vadd.xlane.f32.xlu0 %v56_v11  ;;  %419 = vmatprep.subr.mxu0 %v491_v32  ;;  %v94_v51 = vsub.s32 %v91_v46, %v88_v49  ;;  %v101_v56 = vsub.s32 %v98_v50, %v88_v49  ;;  %vm110_vm4 = vcmask 261312   ;;  %vm131_vm5 = vcmask 1041409   ;;  %v52_v17 = vld [vmem:[#allocation2] sm:$0x3] }
  0x17   :  { %420 = vmatpush3.msra.mxu0 %v225_v35  ;;  %v108_v61 = vsub.s32 %v105_v54, %v88_v49  ;;  %vm221_vm6 = vcmask 1041408   ;;  %vm228_vm7 = vcmask 261120   ;;  %vm303_vm8 = vcmask 15360  }
  0x18   :  { %421 = vmatprep.subr.mxu0 %v491_v32 }
  0x19   :  { %142 = vmax.xlane.f32.xlu1 %v141_v12  ;;  %422 = vmatpush3.msra.mxu0 %v224_v36 }
  0x1a   :  { %139 = vmax.xlane.f32.xlu0 %v138_v13  ;;  %423 = vmatprep.subr.mxu0 %v491_v32 }
  0x1b   :  { %424 = vmatpush3.msra.mxu0 %v223_v37 }
  0x1d   :  { %154 = vmax.xlane.f32.xlu1 %v153_v14 }
  0x1e   :  { %151 = vmax.xlane.f32.xlu0 %v150_v15 }
  0x21   :  { %72 = vadd.xlane.f32.xlu1 %v71_v20 }
  0x22   :  { %60 = vadd.xlane.f32.xlu0 %v59_v21 }
  0x25   :  { %157 = vmax.xlane.f32.xlu1 %v156_v22 }
  0x26   :  { %145 = vmax.xlane.f32.xlu0 %v144_v23 }
  0x29   :  { %75 = vadd.xlane.f32.xlu1 %v74_v28 }
  0x2a   :  { %63 = vadd.xlane.f32.xlu0 %v62_v29 }
  0x2d   :  { %160 = vmax.xlane.f32.xlu1 %v159_v30  ;;  %v137_v30 = vld [vmem:[#allocation3] sm:$0x3] }
  0x2e   :  { %148 = vmax.xlane.f32.xlu0 %v147_v31 }
  0x9a   :  { %v67_v38 = vpop.xlane.xlu1 %66 }
  0x9b   :  { %v55_v39 = vpop.xlane.xlu0 %54  ;;  %v115_v62 = vrot.slane %v67_v38, %v89_v55 }
  0x9c   :  { %v90_v63 = vrot.slane %v55_v39, %v89_v55  ;;  %v227_v39 = vld [vmem:[%s557_s2] sm:$0x3]  ;;  %s464_s2 = scalar_lea.vmem %s398_s28, 32 }
  0x9d   :  { %429 = vmatpush3.msk.msra.mxu1 %vm221_vm6, %v227_v39  ;;  %p465_p5 = scmp.ne.s32.totalorder %s398_s28, %s464_s2  ;;  %p470_p7 = scmp.lt.s32.totalorder %s464_s2, %s464_s2 }
  0x9e   :  { %v70_v40 = vpop.xlane.xlu1 %69 }
  0x9f   :  { %v58_v41 = vpop.xlane.xlu0 %57  ;;  %v119_v57 = vrot.slane %v70_v40, %v94_v51  ;;  %p471_p8 = por %p470_p7, %p469_p6 }
  0xa0   :  { %v95_v58 = vrot.slane %v58_v41, %v94_v51 }
  0xa1   :  { %v120_v2 = vsel %vm96_vm2, %v119_v57, %v115_v62  ;;  %p472_p9 = pnand %p471_p8, %p465_p5 }
  0xa2   :  { %v143_v43 = vpop.xlane.xlu1 %142  ;;  %v97_v3 = vsel %vm96_vm2, %v95_v58, %v90_v63 }
  0xa3   :  { %v140_v44 = vpop.xlane.xlu0 %139  ;;  %v177_v5 = vrot.slane %v143_v43, %v94_v51 }
  0xa4   :  { %v173_v10 = vrot.slane %v140_v44, %v89_v55 }
  0xa6   :  { %v155_v47 = vpop.xlane.xlu1 %154  ;;  %v178_v24 = vsel %vm96_vm2, %v177_v5, %v173_v10 }
  0xa7   :  { %v152_v48 = vpop.xlane.xlu0 %151  ;;  %v196_v6 = vrot.slane %v155_v47, %v94_v51 }
  0xa8   :  { %v192_v7 = vrot.slane %v152_v48, %v89_v55 }
  0xaa   :  { %v73_v52 = vpop.xlane.xlu1 %72  ;;  %v197_v20 = vsel %vm96_vm2, %v196_v6, %v192_v7 }
  0xab   :  { %v61_v53 = vpop.xlane.xlu0 %60  ;;  %v124_v0 = vrot.slane %v73_v52, %v101_v56 }
  0xac   :  { %v102_v1 = vrot.slane %v61_v53, %v101_v56 }
  0xad   :  { %v125_v11 = vsel %vm103_vm3, %v124_v0, %v120_v2 }
  0xae   :  { %v158_v59 = vpop.xlane.xlu1 %157  ;;  %v104_v14 = vsel %vm103_vm3, %v102_v1, %v97_v3 }
  0xaf   :  { %v146_v60 = vpop.xlane.xlu0 %145  ;;  %v201_v12 = vrot.slane %v158_v59, %v101_v56 }
  0xb0   :  { %v182_v15 = vrot.slane %v146_v60, %v101_v56 }
  0xb1   :  { %v202_v25 = vsel %vm103_vm3, %v201_v12, %v197_v20 }
  0xb2   :  { %v76_v4 = vpop.xlane.xlu1 %75  ;;  %v183_v28 = vsel %vm103_vm3, %v182_v15, %v178_v24 }
  0xb3   :  { %v129_v8 = vrot.slane %v76_v4, %v108_v61  ;;  %v64_v9 = vpop.xlane.xlu0 %63 }
  0xb4   :  { %v109_v13 = vrot.slane %v64_v9, %v108_v61 }
  0xb5   :  { %v130_v16 = vsel %vm110_vm4, %v129_v8, %v125_v11 }
  0xb6   :  { %v111_v18 = vsel %vm110_vm4, %v109_v13, %v104_v14  ;;  %v161_v19 = vpop.xlane.xlu1 %160 }
  0xb7   :  { %v132_v21 = vsel %vm131_vm5, %v130_v16, %v111_v18  ;;  %v206_v22 = vrot.slane %v161_v19, %v108_v61  ;;  %v149_v23 = vpop.xlane.xlu0 %148 }
  0xb8   :  { %v134_v26 = vadd.f32 %v132_v21, %v52_v17  ;;  %v187_v27 = vrot.slane %v149_v23, %v108_v61 }
  0xb9   :  { %v207_v29 = vsel %vm110_vm4, %v206_v22, %v202_v25 }
  0xba   :  { %136 = vst.msk [vmem:[#allocation2] sm:$0x3] %vm33_vm0, %v134_v26  ;;  %v188_v31 = vsel %vm110_vm4, %v187_v27, %v183_v28 }
  0xbb   :  { %v208_v32 = vsel %vm131_vm5, %v207_v29, %v188_v31 }
  0xbc   :  { %v210_v33 = vmax.f32 %v137_v30, %v208_v32 }
  0xbe   :  { %211 = vst.msk [vmem:[#allocation3] sm:$0x3] %vm33_vm0, %v210_v33 }
  0xc1   :  { %v215_v34 = vld [vmem:[#allocation2] sm:$0x3] }
  0xc2   :  { %v216_v36 = vmul.f32 0.00390625, %v215_v34 }
  0xc5   :  { %v217_v35 = vld [vmem:[#allocation3] sm:$0x3] }
  0xc6   :  { %v219_v37 = vrot.slane %v217_v35, 6 }
  0xc8   :  { %v222_v38 = vsel %vm221_vm6, %v216_v36, %v219_v37 }
  0xc9   :  { %426 = vmatmul.mubr.msk.f32.vlgmr.msra.gmra.mxu0 %vm228_vm7, %v222_v38 }
 0x189   :  { %v298_v40 = vpop.f32.mrf.mxu0 }
 0x18a   :  { %v302_v41 = vmax.f32 %v298_v40, 0.0 }
 0x18b   :  { %v427_v42 = vpop.f32.mrf.mxu0 }
 0x18c   :  { %431 = vmatmul.mubr.msk.f32.vlgmr.msra.gmra.mxu1 %vm303_vm8, %v302_v41 }
 0x24c   :  { %v376_v43 = vpop.f32.mrf.mxu1 }
 0x24d   :  { %v381_v44 = vrot.slane %v376_v43, 2 }
 0x24e   :  { %v432_v45 = vpop.f32.mrf.mxu1 }
 0x24f   :  { %v383_v46 = vadd.f32 %v381_v44, %v376_v43 }
 0x251   :  { %v409_v47 = vmul.f32 -1.442695, %v383_v46 }
 0x253   :  { %440 = vpow2.f32 %v409_v47 }
 0x260   :  { %v441_v48 = vpop.eup %440 }
 0x261   :  { %v387_v49 = vadd.f32 1.0, %v441_v48 }
 0x263   :  { %442 = vrcp.f32 %v387_v49 }
 0x270   :  { %v443_v50 = vpop.eup %442 }
 0x271   :  { %390 = vst.msk [vmem:[#allocation7] sm:$0x3] %vm33_vm0, %v443_v50 }
 0x272   :  { %475 = shalt.err (!%p472_p9)
}
 0x273   :  { %400 = dma.vmem_to_hbm [thread:$0]  %s398_s28, 32, %s558_s3, [#allocation6]  }
 0x274   :  { %486 = dma.done.wait [#allocation6], 32  }
 0x275   :  { %487 = vsyncadd [#allocation6], 4294967264 }
 0x276   :  { %404 = vsyncpa [#allocation5], 1 }
 0x277   :  { %405 = vsyncpa [#allocation6], 1 }

</bundles_post_ra>
